<compile_context>
chip_gen: v5e
topology: v5e:2x2
jax: 0.10.0
libtpu: 0.0.40
codegen_flags: <defaults>
</compile_context>

<pallas_src>
import functools

import jax
import jax.numpy as jnp
from jax.experimental import pallas as pl
from jax.experimental.pallas import tpu as pltpu


# ---------------------------------------------------------------------------
# Helpers
# ---------------------------------------------------------------------------
def _rup(n, m):
    return ((n + m - 1) // m) * m


def _pad_to(a, shape):
    pads = [(0, s - d) for d, s in zip(a.shape, shape)]
    return jnp.pad(a, pads)


def _pick_tile(total, target):
    """Largest multiple-of-128 divisor of `total` that is <= target (total is a 128-multiple)."""
    target = max(128, min(total, (target // 128) * 128))
    best, t = 128, 128
    while t <= target:
        if total % t == 0:
            best = t
        t += 128
    return best


def _const_spec(shape):
    n = len(shape)
    return pl.BlockSpec(shape, lambda j, _n=n: (0,) * _n)


def _safe_normalize(x):
    return x * jax.lax.rsqrt(jnp.sum(x * x, axis=-1, keepdims=True) + 1e-12)


def _slerp(a, b, t):
    """Reference slerp; d clamped only inside arccos (numerics hardening)."""
    a = _safe_normalize(a)
    b = _safe_normalize(b)
    d = jnp.sum(a * b, axis=-1, keepdims=True)
    p = t * jnp.arccos(jnp.clip(d, -1.0, 1.0))
    c = _safe_normalize(b - d * a)
    out = a * jnp.cos(p) + c * jnp.sin(p)
    return _safe_normalize(out)


# ---------------------------------------------------------------------------
# In-kernel building blocks
# ---------------------------------------------------------------------------
def _mm(x, w):
    """bf16 MXU matmul with f32 accumulation."""
    return jnp.dot(x.astype(jnp.bfloat16), w, preferred_element_type=jnp.float32)


def _rnorm(x):
    return x * jax.lax.rsqrt(jnp.sum(x * x, axis=-1, keepdims=True) + 1e-12)


def _mapping_wt(wt_ref, z01_ref, c01_ref, t_ref,
                w1z_ref, w1c_ref, b1_ref, w2_ref, b2_ref, *, space, B):
    """2-layer mapping MLP on the stacked [2B] rows; w-space lerp folded in. Returns wt [2B,WK]."""
    h = jnp.maximum(_mm(z01_ref[...], w1z_ref[...]) + _mm(c01_ref[...], w1c_ref[...])
                    + b1_ref[...], 0.0)
    w_all = _mm(h, w2_ref[...]) + b2_ref[...]                 # [2B, WK] f32
    if space == "w":
        w0 = w_all[:B]
        d = w_all[B:] - w0
        tt = t_ref[...]                                       # [B, 2] = [t, t + eps]
        wt_ref[0:B, :] = w0 + tt[:, 0:1] * d                  # lerp(w0, w1, t)
        wt_ref[B:2 * B, :] = w0 + tt[:, 1:2] * d              # lerp(w0, w1, t + eps)
    else:
        wt_ref[...] = w_all
    return wt_ref[...]


def _synth_tile(wt, wsyn_ref, beff_ref):
    """Dense synthesis stand-in tile: matmul + noise-folded bias + tanh + (x+1)*127.5."""
    return (jnp.tanh(_mm(wt, wsyn_ref[...]) + beff_ref[...]) + 1.0) * (255.0 / 2.0)


def _lpips_epilogue(acc, bvgg, B, inv_eps2, out_shape):
    f = jnp.maximum(acc + bvgg, 0.0)
    f = _rnorm(f)
    d = f[:B] - f[B:]
    dist = jnp.sum(d * d, axis=-1, keepdims=True) * inv_eps2  # [B, 1]
    return jnp.broadcast_to(dist, out_shape)                  # lane-dense [B, 128]


# ---------------------------------------------------------------------------
# Kernel 1 (fast path): mapping + synthesis + VGG-LPIPS + distance, fully fused.
# Grid axis = SYN_N column tiles = VGG contraction axis -> "arbitrary" (reduction carry).
# ---------------------------------------------------------------------------
def _fused_ppl_kernel(z01_ref, c01_ref, t_ref, w1z_ref, w1c_ref, b1_ref, w2_ref, b2_ref,
                      wsyn_ref, beff_ref, wvgg_ref, bvgg_ref,
                      dist_ref, wt_ref, acc_ref, *, space, B, inv_eps2):
    j = pl.program_id(0)

    @pl.when(j == 0)
    def _():
        acc_ref[...] = jnp.zeros_like(acc_ref)

    wt = _mapping_wt(wt_ref, z01_ref, c01_ref, t_ref,
                     w1z_ref, w1c_ref, b1_ref, w2_ref, b2_ref, space=space, B=B)
    img = _synth_tile(wt, wsyn_ref, beff_ref)                 # [2B, TILE_N] f32, stays in vregs
    acc_ref[...] += _mm(img, wvgg_ref[...])                   # VGG partial sum, f32 scratch

    @pl.when(j == pl.num_programs(0) - 1)
    def _():
        dist_ref[...] = _lpips_epilogue(acc_ref[...], bvgg_ref[...], B, inv_eps2,
                                        dist_ref.shape)


# ---------------------------------------------------------------------------
# Kernel 2a (general path): mapping + synthesis; bf16 image tiles to HBM.
# SYN_N tiles are independent -> "parallel" (shards over v7x's 2 TensorCores).
# ---------------------------------------------------------------------------
def _gen_img_kernel(z01_ref, c01_ref, t_ref, w1z_ref, w1c_ref, b1_ref, w2_ref, b2_ref,
                    wsyn_ref, beff_ref, img_ref, wt_ref, *, space, B):
    wt = _mapping_wt(wt_ref, z01_ref, c01_ref, t_ref,
                     w1z_ref, w1c_ref, b1_ref, w2_ref, b2_ref, space=space, B=B)
    img_ref[...] = _synth_tile(wt, wsyn_ref, beff_ref).astype(img_ref.dtype)


# ---------------------------------------------------------------------------
# Kernel 2b (general path): VGG-LPIPS stand-in with tiled K reduction + distance epilogue.
# ---------------------------------------------------------------------------
def _lpips_dist_kernel(x01_ref, wvgg_ref, bvgg_ref, dist_ref, acc_ref, *, B, inv_eps2):
    k = pl.program_id(0)

    @pl.when(k == 0)
    def _():
        acc_ref[...] = jnp.zeros_like(acc_ref)

    acc_ref[...] += _mm(x01_ref[...], wvgg_ref[...])

    @pl.when(k == pl.num_programs(0) - 1)
    def _():
        dist_ref[...] = _lpips_epilogue(acc_ref[...], bvgg_ref[...], B, inv_eps2,
                                        dist_ref.shape)


# ---------------------------------------------------------------------------
# Wrapper
# ---------------------------------------------------------------------------
class PPLSamplerPallas:
    """JAX/Pallas re-implementation of PPLSampler.forward with synthetic G / VGG16 stand-ins."""

    def __init__(self, epsilon=1e-2, space="z", sampling="full", crop=False,
                 z_dim=32, c_dim=4, w_dim=32, num_ws=4,
                 img_resolution=16, img_channels=3,
                 hidden=32, feat_dim=64, seed=0,
                 tile_n=4096, vmem_limit_bytes=32 * 1024 * 1024):
        assert space in ("z", "w")
        assert sampling in ("full", "end")
        self.epsilon = float(epsilon)
        self.space = space
        self.sampling = sampling
        self.crop = crop
        self.z_dim = z_dim
        self.c_dim = c_dim
        self.w_dim = w_dim
        self.num_ws = num_ws
        self.img_resolution = img_resolution
        self.img_channels = img_channels
        self.H = self.W = img_resolution
        self.vmem_limit_bytes = int(vmem_limit_bytes)

        f32, bf16 = jnp.float32, jnp.bfloat16

        # Contraction (K) dims padded only to the bf16 sublane multiple (16);
        # lane (output) dims padded to multiples of 128.
        self.ZK = _rup(z_dim, 16)
        self.CK = _rup(c_dim, 16)
        self.HN = _rup(hidden, 16)
        self.WK = _rup(w_dim, 16)
        self.D_img = img_channels * self.H * self.W
        self.SYN_N = _rup(self.D_img, 128)
        self.FP = _rup(feat_dim, 128)

        # Effective spatial size the VGG stand-in sees (after optional crop / downsample).
        ch, cw = self.H, self.W
        if crop:
            cq = self.H // 8
            ch, cw = 4 * cq, 4 * cq
        factor = img_resolution // 256
        if factor > 1:
            ch //= factor
            cw //= factor
        vgg_chan = 3 if img_channels == 1 else img_channels
        self.VGG_K = vgg_chan * ch * cw

        # Fused path is valid when the image post-processing is the identity.
        self.fused = (not crop) and (factor <= 1) and (img_channels != 1)
        self.VGG_KP = self.SYN_N if self.fused else _rup(self.VGG_K, 128)

        # Generation-specific tile sizes (multiple-of-128 divisors of the padded extents).
        self.TILE_N = _pick_tile(self.SYN_N, tile_n)
        self.NT = self.SYN_N // self.TILE_N
        self.TILE_K = _pick_tile(self.VGG_KP, tile_n)
        self.KT = self.VGG_KP // self.TILE_K

        ks = jax.random.split(jax.random.PRNGKey(seed), 5)
        s = 0.1

        w1 = s * jax.random.normal(ks[0], (z_dim + c_dim, hidden), f32)
        self.w1z = _pad_to(w1[:z_dim], (self.ZK, self.HN)).astype(bf16)
        self.w1c = _pad_to(w1[z_dim:], (self.CK, self.HN)).astype(bf16)
        self.b1 = jnp.zeros((1, self.HN), f32)

        w2 = s * jax.random.normal(ks[1], (hidden, w_dim), f32)
        self.w2 = _pad_to(w2, (self.HN, self.WK)).astype(bf16)
        self.b2 = jnp.zeros((1, self.WK), f32)

        # ws broadcasts one w vector across num_ws, so the dense synthesis stand-in's
        # (num_ws*w_dim, D_img) weight folds exactly into (w_dim, D_img).
        syn = s * jax.random.normal(ks[2], (num_ws * w_dim, self.D_img), f32)
        syn_folded = syn.reshape(num_ws, w_dim, self.D_img).sum(axis=0)
        self.wsyn = _pad_to(syn_folded, (self.WK, self.SYN_N)).astype(bf16)
        self.bsyn = jnp.zeros((1, self.SYN_N), f32)

        # wvgg padded K rows are zero -> padded (127.5-valued) image columns contribute nothing.
        vggw = (s / 16.0) * jax.random.normal(ks[3], (self.VGG_K, feat_dim), f32)
        self.wvgg = _pad_to(vggw, (self.VGG_KP, self.FP)).astype(bf16)
        self.bvgg = _pad_to(0.01 * jax.random.normal(ks[4], (1, feat_dim), f32), (1, self.FP))

        self._jit_forward = jax.jit(self._forward_impl)

    # crop / downsample / channel-tile glue for the general path (fuses under jit).
    def _postprocess(self, img_flat):
        n = img_flat.shape[0]
        img = img_flat[:, :self.D_img].astype(jnp.float32)
        img = img.reshape(n, self.img_channels, self.H, self.W)
        if self.crop:
            assert img.shape[2] == img.shape[3]
            cq = img.shape[2] // 8
            img = img[:, :, cq * 3:cq * 7, cq * 2:cq * 6]
        factor = self.img_resolution // 256
        if factor > 1:
            img = img.reshape(n, img.shape[1], img.shape[2] // factor, factor,
                              img.shape[3] // factor, factor).mean(axis=(3, 5))
        if self.img_channels == 1:
            img = jnp.tile(img, (1, 3, 1, 1))
        flat = img.reshape(n, -1)
        if flat.shape[1] < self.VGG_KP:
            flat = jnp.pad(flat, ((0, 0), (0, self.VGG_KP - flat.shape[1])))
        return flat.astype(jnp.bfloat16)

    def _forward_impl(self, c, key):
        B = c.shape[0]
        B2 = 2 * B
        f32 = jnp.float32
        kt, kz, kn = jax.random.split(key, 3)

        t = jax.random.uniform(kt, (B,), f32)
        if self.sampling != "full":
            t = t * 0.0
        t_col = t[:, None]

        z = jax.random.normal(kz, (B2, self.z_dim), f32)
        z0, z1 = z[:B], z[B:]

        # slerp lives once in the glue (dedup); kernel receives the stacked [2B] rows.
        if self.space == "z":
            zt0 = _slerp(z0, z1, t_col)
            zt1 = _slerp(z0, z1, t_col + self.epsilon)
            z01 = jnp.concatenate([zt0, zt1], axis=0)
        else:
            z01 = z                                            # [z0; z1], lerped in w-space in-kernel
        z01p = _pad_to(z01, (B2, self.ZK))
        c01p = _pad_to(jnp.concatenate([c, c], axis=0).astype(f32), (B2, self.CK))
        tcoef = jnp.concatenate([t_col, t_col + self.epsilon], axis=1)      # [B, 2]

        # noise_const buffers are resampled every forward call (as in the reference);
        # noise is folded into the synthesis bias.
        noise = jax.random.normal(kn, (self.img_channels, self.H, self.W), f32)
        beff = self.bsyn + _pad_to(noise.reshape(1, -1), (1, self.SYN_N))

        gen_args = (z01p, c01p, tcoef, self.w1z, self.w1c, self.b1, self.w2, self.b2,
                    self.wsyn, beff)
        gen_in_specs = [
            _const_spec((B2, self.ZK)),
            _const_spec((B2, self.CK)),
            _const_spec((B, 2)),
            _const_spec((self.ZK, self.HN)),
            _const_spec((self.CK, self.HN)),
            _const_spec((1, self.HN)),
            _const_spec((self.HN, self.WK)),
            _const_spec((1, self.WK)),
            pl.BlockSpec((self.WK, self.TILE_N), lambda j: (0, j)),
            pl.BlockSpec((1, self.TILE_N), lambda j: (0, j)),
        ]
        inv_eps2 = 1.0 / (self.epsilon ** 2)

        if self.fused:
            dist = pl.pallas_call(
                functools.partial(_fused_ppl_kernel, space=self.space, B=B, inv_eps2=inv_eps2),
                grid=(self.NT,),
                in_specs=gen_in_specs + [
                    pl.BlockSpec((self.TILE_N, self.FP), lambda j: (j, 0)),
                    _const_spec((1, self.FP)),
                ],
                out_specs=pl.BlockSpec((B, 128), lambda j: (0, 0)),
                out_shape=jax.ShapeDtypeStruct((B, 128), jnp.float32),
                scratch_shapes=[pltpu.VMEM((B2, self.WK), jnp.float32),
                                pltpu.VMEM((B2, self.FP), jnp.float32)],
                compiler_params=pltpu.CompilerParams(
                    dimension_semantics=("arbitrary",),
                    vmem_limit_bytes=self.vmem_limit_bytes),
            )(*gen_args, self.wvgg, self.bvgg)
            return dist[:, 0]

        # General path: bf16 image slab -> XLA crop/downsample glue -> tiled LPIPS reduction.
        img = pl.pallas_call(
            functools.partial(_gen_img_kernel, space=self.space, B=B),
            grid=(self.NT,),
            in_specs=gen_in_specs,
            out_specs=pl.BlockSpec((B2, self.TILE_N), lambda j: (0, j)),
            out_shape=jax.ShapeDtypeStruct((B2, self.SYN_N), jnp.bfloat16),
            scratch_shapes=[pltpu.VMEM((B2, self.WK), jnp.float32)],
            compiler_params=pltpu.CompilerParams(
                dimension_semantics=("parallel",),
                vmem_limit_bytes=self.vmem_limit_bytes),
        )(*gen_args)

        x01 = self._postprocess(img)                           # [2B, VGG_KP] bf16

        dist = pl.pallas_call(
            functools.partial(_lpips_dist_kernel, B=B, inv_eps2=inv_eps2),
            grid=(self.KT,),
            in_specs=[pl.BlockSpec((B2, self.TILE_K), lambda k: (0, k)),
                      pl.BlockSpec((self.TILE_K, self.FP), lambda k: (k, 0)),
                      _const_spec((1, self.FP))],
            out_specs=pl.BlockSpec((B, 128), lambda k: (0, 0)),
            out_shape=jax.ShapeDtypeStruct((B, 128), jnp.float32),
            scratch_shapes=[pltpu.VMEM((B2, self.FP), jnp.float32)],
            compiler_params=pltpu.CompilerParams(
                dimension_semantics=("arbitrary",),
                vmem_limit_bytes=self.vmem_limit_bytes),
        )(x01, self.wvgg, self.bvgg)
        return dist[:, 0]

    def forward(self, c, key):
        return self._jit_forward(c, key)


if __name__ == "__main__":
    key = jax.random.PRNGKey(0)
    kc, k1, k2, k3 = jax.random.split(key, 4)

    B, C_DIM = 2, 4
    c = jax.random.normal(kc, (B, C_DIM), dtype=jnp.float32)

    # 1) Primary config: fused single-kernel path (no image HBM roundtrip).
    #    tile_n=256 -> 3-step SYN_N grid (768/256) to exercise the tiled reduction.
    sampler = PPLSamplerPallas(epsilon=1e-2, space="z", sampling="full", crop=False,
                               z_dim=32, c_dim=C_DIM, w_dim=32, num_ws=4,
                               img_resolution=16, img_channels=3,
                               hidden=32, feat_dim=64, seed=0, tile_n=256)
    d0 = jax.block_until_ready(sampler.forward(c, k1))
    assert d0.shape == (B,) and bool(jnp.all(jnp.isfinite(d0)))

    # 2) w-space (fused path, in-kernel lerp of the mapped w's).
    sampler_w = PPLSamplerPallas(epsilon=1e-2, space="w", sampling="full", crop=False,
                                 z_dim=32, c_dim=C_DIM, w_dim=32, num_ws=4,
                                 img_resolution=16, img_channels=3,
                                 hidden=32, feat_dim=64, seed=0, tile_n=256)
    d1 = jax.block_until_ready(sampler_w.forward(c, k2))
    assert d1.shape == (B,) and bool(jnp.all(jnp.isfinite(d1)))

    # 3) crop=True: general two-kernel path (bf16 images, tiled VGG-K reduction).
    sampler_c = PPLSamplerPallas(epsilon=1e-2, space="z", sampling="full", crop=True,
                                 z_dim=32, c_dim=C_DIM, w_dim=32, num_ws=4,
                                 img_resolution=16, img_channels=3,
                                 hidden=32, feat_dim=64, seed=0, tile_n=128)
    d2 = jax.block_until_ready(sampler_c.forward(c, k3))
    assert d2.shape == (B,) and bool(jnp.all(jnp.isfinite(d2)))

    print("KERNEL_OK")
</pallas_src>

<mosaic_0001>
module attributes {stable_mosaic.version = 11 : i64} {
  func.func @_fused_ppl_kernel(%arg0: i32, %arg1: memref<4x32xf32, #tpu.memory_space<vmem>>, %arg2: memref<4x16xf32, #tpu.memory_space<vmem>>, %arg3: memref<2x2xf32, #tpu.memory_space<vmem>>, %arg4: memref<32x32xbf16, #tpu.memory_space<vmem>>, %arg5: memref<16x32xbf16, #tpu.memory_space<vmem>>, %arg6: memref<1x32xf32, #tpu.memory_space<vmem>>, %arg7: memref<32x32xbf16, #tpu.memory_space<vmem>>, %arg8: memref<1x32xf32, #tpu.memory_space<vmem>>, %arg9: memref<32x256xbf16, #tpu.memory_space<vmem>>, %arg10: memref<1x256xf32, #tpu.memory_space<vmem>>, %arg11: memref<256x128xbf16, #tpu.memory_space<vmem>>, %arg12: memref<1x128xf32, #tpu.memory_space<vmem>>, %arg13: memref<2x128xf32, #tpu.memory_space<vmem>>, %arg14: memref<4x32xf32, #tpu.memory_space<vmem>>, %arg15: memref<4x128xf32, #tpu.memory_space<vmem>>) attributes {dimension_semantics = [#tpu.dimension_semantics<arbitrary>], iteration_bounds = array<i64: 3>, scalar_prefetch = 0 : i64, scratch_operands = 2 : i64, tpu.core_type = #tpu.core_type<tc>, window_params = [{pipeline_mode = #tpu.pipeline_mode<synchronous>, transform_indices = @transform_0, window_bounds = array<i64: 4, 32>}, {pipeline_mode = #tpu.pipeline_mode<synchronous>, transform_indices = @transform_1, window_bounds = array<i64: 4, 16>}, {pipeline_mode = #tpu.pipeline_mode<synchronous>, transform_indices = @transform_2, window_bounds = array<i64: 2, 2>}, {pipeline_mode = #tpu.pipeline_mode<synchronous>, transform_indices = @transform_3, window_bounds = array<i64: 32, 32>}, {pipeline_mode = #tpu.pipeline_mode<synchronous>, transform_indices = @transform_4, window_bounds = array<i64: 16, 32>}, {pipeline_mode = #tpu.pipeline_mode<synchronous>, transform_indices = @transform_5, window_bounds = array<i64: 1, 32>}, {pipeline_mode = #tpu.pipeline_mode<synchronous>, transform_indices = @transform_6, window_bounds = array<i64: 32, 32>}, {pipeline_mode = #tpu.pipeline_mode<synchronous>, transform_indices = @transform_7, window_bounds = array<i64: 1, 32>}, {transform_indices = @transform_8, window_bounds = array<i64: 32, 256>}, {transform_indices = @transform_9, window_bounds = array<i64: 1, 256>}, {transform_indices = @transform_10, window_bounds = array<i64: 256, 128>}, {pipeline_mode = #tpu.pipeline_mode<synchronous>, transform_indices = @transform_11, window_bounds = array<i64: 1, 128>}, {pipeline_mode = #tpu.pipeline_mode<synchronous>, transform_indices = @transform_12, window_bounds = array<i64: 2, 128>}]} {
    %c0_i32 = arith.constant 0 : i32
    %0 = arith.cmpi eq, %arg0, %c0_i32 : i32
    %1 = arith.extui %0 : i1 to i32
    %c0_i32_0 = arith.constant 0 : i32
    %2 = arith.cmpi ne, %1, %c0_i32_0 : i32
    scf.if %2 {
      %cst_36 = arith.constant 0.000000e+00 : f32
      %45 = vector.broadcast %cst_36 : f32 to vector<4x128xf32>
      %c0_37 = arith.constant 0 : index
      %c0_38 = arith.constant 0 : index
      %46 = vector.load %arg15[%c0_37, %c0_38] : memref<4x128xf32, #tpu.memory_space<vmem>>, vector<4x128xf32>
      tpu.vector_store %arg15[%c0_37, %c0_38], %45 {strides = array<i32>} : memref<4x128xf32, #tpu.memory_space<vmem>>, vector<4x128xf32>,
    } else {
    }
    %c0 = arith.constant 0 : index
    %c0_1 = arith.constant 0 : index
    %3 = vector.load %arg1[%c0, %c0_1] : memref<4x32xf32, #tpu.memory_space<vmem>>, vector<4x32xf32>
    %c0_2 = arith.constant 0 : index
    %c0_3 = arith.constant 0 : index
    %4 = vector.load %arg4[%c0_2, %c0_3] : memref<32x32xbf16, #tpu.memory_space<vmem>>, vector<32x32xbf16>
    %5 = arith.truncf %3 : vector<4x32xf32> to vector<4x32xbf16>
    %cst = arith.constant dense<0.000000e+00> : vector<4x32xf32>
    %6 = tpu.matmul %5, %4, %cst {dimension_numbers = #tpu.dot_dimension_numbers<[1], [0], [0], [1], [0, 0, 1, 1], [], []>} : vector<4x32xbf16>, vector<32x32xbf16>, vector<4x32xf32> -> vector<4x32xf32>
    %c0_4 = arith.constant 0 : index
    %c0_5 = arith.constant 0 : index
    %7 = vector.load %arg2[%c0_4, %c0_5] : memref<4x16xf32, #tpu.memory_space<vmem>>, vector<4x16xf32>
    %c0_6 = arith.constant 0 : index
    %c0_7 = arith.constant 0 : index
    %8 = vector.load %arg5[%c0_6, %c0_7] : memref<16x32xbf16, #tpu.memory_space<vmem>>, vector<16x32xbf16>
    %9 = arith.truncf %7 : vector<4x16xf32> to vector<4x16xbf16>
    %cst_8 = arith.constant dense<0.000000e+00> : vector<4x32xf32>
    %10 = tpu.matmul %9, %8, %cst_8 {dimension_numbers = #tpu.dot_dimension_numbers<[1], [0], [0], [1], [0, 0, 1, 1], [], []>} : vector<4x16xbf16>, vector<16x32xbf16>, vector<4x32xf32> -> vector<4x32xf32>
    %11 = arith.addf %6, %10 : vector<4x32xf32>
    %c0_9 = arith.constant 0 : index
    %c0_10 = arith.constant 0 : index
    %12 = vector.load %arg6[%c0_9, %c0_10] : memref<1x32xf32, #tpu.memory_space<vmem>>, vector<1x32xf32>
    %13 = vector.broadcast %12 : vector<1x32xf32> to vector<4x32xf32>
    %14 = arith.addf %11, %13 : vector<4x32xf32>
    %cst_11 = arith.constant 0.000000e+00 : f32
    %15 = vector.broadcast %cst_11 : f32 to vector<4x32xf32>
    %16 = arith.maximumf %14, %15 : vector<4x32xf32>
    %c0_12 = arith.constant 0 : index
    %c0_13 = arith.constant 0 : index
    %17 = vector.load %arg7[%c0_12, %c0_13] : memref<32x32xbf16, #tpu.memory_space<vmem>>, vector<32x32xbf16>
    %18 = arith.truncf %16 : vector<4x32xf32> to vector<4x32xbf16>
    %cst_14 = arith.constant dense<0.000000e+00> : vector<4x32xf32>
    %19 = tpu.matmul %18, %17, %cst_14 {dimension_numbers = #tpu.dot_dimension_numbers<[1], [0], [0], [1], [0, 0, 1, 1], [], []>} : vector<4x32xbf16>, vector<32x32xbf16>, vector<4x32xf32> -> vector<4x32xf32>
    %c0_15 = arith.constant 0 : index
    %c0_16 = arith.constant 0 : index
    %20 = vector.load %arg8[%c0_15, %c0_16] : memref<1x32xf32, #tpu.memory_space<vmem>>, vector<1x32xf32>
    %21 = vector.broadcast %20 : vector<1x32xf32> to vector<4x32xf32>
    %22 = arith.addf %19, %21 : vector<4x32xf32>
    %c0_17 = arith.constant 0 : index
    %c0_18 = arith.constant 0 : index
    %23 = vector.load %arg14[%c0_17, %c0_18] : memref<4x32xf32, #tpu.memory_space<vmem>>, vector<4x32xf32>
    tpu.vector_store %arg14[%c0_17, %c0_18], %22 {strides = array<i32>} : memref<4x32xf32, #tpu.memory_space<vmem>>, vector<4x32xf32>,
    %c0_19 = arith.constant 0 : index
    %c0_20 = arith.constant 0 : index
    %24 = vector.load %arg14[%c0_19, %c0_20] : memref<4x32xf32, #tpu.memory_space<vmem>>, vector<4x32xf32>
    %c0_21 = arith.constant 0 : index
    %c0_22 = arith.constant 0 : index
    %25 = vector.load %arg9[%c0_21, %c0_22] : memref<32x256xbf16, #tpu.memory_space<vmem>>, vector<32x256xbf16>
    %26 = arith.truncf %24 : vector<4x32xf32> to vector<4x32xbf16>
    %cst_23 = arith.constant dense<0.000000e+00> : vector<4x256xf32>
    %27 = tpu.matmul %26, %25, %cst_23 {dimension_numbers = #tpu.dot_dimension_numbers<[1], [0], [0], [1], [0, 0, 1, 1], [], []>} : vector<4x32xbf16>, vector<32x256xbf16>, vector<4x256xf32> -> vector<4x256xf32>
    %c0_24 = arith.constant 0 : index
    %c0_25 = arith.constant 0 : index
    %28 = vector.load %arg10[%c0_24, %c0_25] : memref<1x256xf32, #tpu.memory_space<vmem>>, vector<1x256xf32>
    %29 = vector.broadcast %28 : vector<1x256xf32> to vector<4x256xf32>
    %30 = arith.addf %27, %29 : vector<4x256xf32>
    %31 = math.tanh %30 : vector<4x256xf32>
    %cst_26 = arith.constant 1.000000e+00 : f32
    %32 = vector.broadcast %cst_26 : f32 to vector<4x256xf32>
    %33 = arith.addf %31, %32 : vector<4x256xf32>
    %cst_27 = arith.constant 1.275000e+02 : f32
    %34 = vector.broadcast %cst_27 : f32 to vector<4x256xf32>
    %35 = arith.mulf %33, %34 : vector<4x256xf32>
    %c0_28 = arith.constant 0 : index
    %c0_29 = arith.constant 0 : index
    %36 = vector.load %arg15[%c0_28, %c0_29] : memref<4x128xf32, #tpu.memory_space<vmem>>, vector<4x128xf32>
    %c0_30 = arith.constant 0 : index
    %c0_31 = arith.constant 0 : index
    %37 = vector.load %arg11[%c0_30, %c0_31] : memref<256x128xbf16, #tpu.memory_space<vmem>>, vector<256x128xbf16>
    %38 = arith.truncf %35 : vector<4x256xf32> to vector<4x256xbf16>
    %cst_32 = arith.constant dense<0.000000e+00> : vector<4x128xf32>
    %39 = tpu.matmul %38, %37, %cst_32 {dimension_numbers = #tpu.dot_dimension_numbers<[1], [0], [0], [1], [0, 0, 1, 1], [], []>} : vector<4x256xbf16>, vector<256x128xbf16>, vector<4x128xf32> -> vector<4x128xf32>
    %40 = arith.addf %36, %39 : vector<4x128xf32>
    %c0_33 = arith.constant 0 : index
    %c0_34 = arith.constant 0 : index
    %41 = vector.load %arg15[%c0_33, %c0_34] : memref<4x128xf32, #tpu.memory_space<vmem>>, vector<4x128xf32>
    tpu.vector_store %arg15[%c0_33, %c0_34], %40 {strides = array<i32>} : memref<4x128xf32, #tpu.memory_space<vmem>>, vector<4x128xf32>,
    %c2_i32 = arith.constant 2 : i32
    %42 = arith.cmpi eq, %arg0, %c2_i32 : i32
    %43 = arith.extui %42 : i1 to i32
    %c0_i32_35 = arith.constant 0 : i32
    %44 = arith.cmpi ne, %43, %c0_i32_35 : i32
    scf.if %44 {
      %c0_36 = arith.constant 0 : index
      %c0_37 = arith.constant 0 : index
      %45 = vector.load %arg15[%c0_36, %c0_37] : memref<4x128xf32, #tpu.memory_space<vmem>>, vector<4x128xf32>
      %c0_38 = arith.constant 0 : index
      %c0_39 = arith.constant 0 : index
      %46 = vector.load %arg12[%c0_38, %c0_39] : memref<1x128xf32, #tpu.memory_space<vmem>>, vector<1x128xf32>
      %47 = vector.broadcast %46 : vector<1x128xf32> to vector<4x128xf32>
      %48 = arith.addf %45, %47 : vector<4x128xf32>
      %cst_40 = arith.constant 0.000000e+00 : f32
      %49 = vector.broadcast %cst_40 : f32 to vector<4x128xf32>
      %50 = arith.maximumf %48, %49 : vector<4x128xf32>
      %51 = arith.mulf %50, %50 : vector<4x128xf32>
      %cst_41 = arith.constant dense<0.000000e+00> : vector<4xf32>
      %52 = vector.multi_reduction <add>, %51, %cst_41 [1] : vector<4x128xf32> to vector<4xf32>
      %53 = vector.shape_cast %52 : vector<4xf32> to vector<4x1xf32>
      %cst_42 = arith.constant 9.99999996E-13 : f32
      %54 = vector.broadcast %cst_42 : f32 to vector<4x1xf32>
      %55 = arith.addf %53, %54 : vector<4x1xf32>
      %56 = math.rsqrt %55 : vector<4x1xf32>
      %57 = vector.broadcast %56 : vector<4x1xf32> to vector<4x128xf32>
      %58 = arith.mulf %50, %57 : vector<4x128xf32>
      %59 = vector.extract_strided_slice %58 {offsets = [0, 0], sizes = [2, 128], strides = [1, 1]} : vector<4x128xf32> to vector<2x128xf32>
      %60 = vector.extract_strided_slice %58 {offsets = [2, 0], sizes = [2, 128], strides = [1, 1]} : vector<4x128xf32> to vector<2x128xf32>
      %61 = arith.subf %59, %60 : vector<2x128xf32>
      %62 = arith.mulf %61, %61 : vector<2x128xf32>
      %cst_43 = arith.constant dense<0.000000e+00> : vector<2xf32>
      %63 = vector.multi_reduction <add>, %62, %cst_43 [1] : vector<2x128xf32> to vector<2xf32>
      %64 = vector.shape_cast %63 : vector<2xf32> to vector<2x1xf32>
      %cst_44 = arith.constant 1.000000e+04 : f32
      %65 = vector.broadcast %cst_44 : f32 to vector<2x1xf32>
      %66 = arith.mulf %64, %65 : vector<2x1xf32>
      %67 = vector.shape_cast %66 : vector<2x1xf32> to vector<2x1xf32>
      %68 = vector.broadcast %67 : vector<2x1xf32> to vector<2x128xf32>
      %c0_45 = arith.constant 0 : index
      %c0_46 = arith.constant 0 : index
      %69 = vector.load %arg13[%c0_45, %c0_46] : memref<2x128xf32, #tpu.memory_space<vmem>>, vector<2x128xf32>
      tpu.vector_store %arg13[%c0_45, %c0_46], %68 {strides = array<i32>} : memref<2x128xf32, #tpu.memory_space<vmem>>, vector<2x128xf32>,
    } else {
    }
    return
  }
  func.func @transform_0(%arg0: i32) -> (i32, i32) {
    %c0_i32 = arith.constant 0 : i32
    %c0_i32_0 = arith.constant 0 : i32
    %c0_i32_1 = arith.constant 0 : i32
    return %c0_i32, %c0_i32_0 : i32, i32
  }
  func.func @transform_1(%arg0: i32) -> (i32, i32) {
    %c0_i32 = arith.constant 0 : i32
    %c0_i32_0 = arith.constant 0 : i32
    %c0_i32_1 = arith.constant 0 : i32
    return %c0_i32, %c0_i32_0 : i32, i32
  }
  func.func @transform_2(%arg0: i32) -> (i32, i32) {
    %c0_i32 = arith.constant 0 : i32
    %c0_i32_0 = arith.constant 0 : i32
    %c0_i32_1 = arith.constant 0 : i32
    return %c0_i32, %c0_i32_0 : i32, i32
  }
  func.func @transform_3(%arg0: i32) -> (i32, i32) {
    %c0_i32 = arith.constant 0 : i32
    %c0_i32_0 = arith.constant 0 : i32
    %c0_i32_1 = arith.constant 0 : i32
    return %c0_i32, %c0_i32_0 : i32, i32
  }
  func.func @transform_4(%arg0: i32) -> (i32, i32) {
    %c0_i32 = arith.constant 0 : i32
    %c0_i32_0 = arith.constant 0 : i32
    %c0_i32_1 = arith.constant 0 : i32
    return %c0_i32, %c0_i32_0 : i32, i32
  }
  func.func @transform_5(%arg0: i32) -> (i32, i32) {
    %c0_i32 = arith.constant 0 : i32
    %c0_i32_0 = arith.constant 0 : i32
    %c0_i32_1 = arith.constant 0 : i32
    return %c0_i32, %c0_i32_0 : i32, i32
  }
  func.func @transform_6(%arg0: i32) -> (i32, i32) {
    %c0_i32 = arith.constant 0 : i32
    %c0_i32_0 = arith.constant 0 : i32
    %c0_i32_1 = arith.constant 0 : i32
    return %c0_i32, %c0_i32_0 : i32, i32
  }
  func.func @transform_7(%arg0: i32) -> (i32, i32) {
    %c0_i32 = arith.constant 0 : i32
    %c0_i32_0 = arith.constant 0 : i32
    %c0_i32_1 = arith.constant 0 : i32
    return %c0_i32, %c0_i32_0 : i32, i32
  }
  func.func @transform_8(%arg0: i32) -> (i32, i32) {
    %c0_i32 = arith.constant 0 : i32
    %c0_i32_0 = arith.constant 0 : i32
    return %c0_i32, %arg0 : i32, i32
  }
  func.func @transform_9(%arg0: i32) -> (i32, i32) {
    %c0_i32 = arith.constant 0 : i32
    %c0_i32_0 = arith.constant 0 : i32
    return %c0_i32, %arg0 : i32, i32
  }
  func.func @transform_10(%arg0: i32) -> (i32, i32) {
    %c0_i32 = arith.constant 0 : i32
    %c0_i32_0 = arith.constant 0 : i32
    return %arg0, %c0_i32 : i32, i32
  }
  func.func @transform_11(%arg0: i32) -> (i32, i32) {
    %c0_i32 = arith.constant 0 : i32
    %c0_i32_0 = arith.constant 0 : i32
    %c0_i32_1 = arith.constant 0 : i32
    return %c0_i32, %c0_i32_0 : i32, i32
  }
  func.func @transform_12(%arg0: i32) -> (i32, i32) {
    %c0_i32 = arith.constant 0 : i32
    %c0_i32_0 = arith.constant 0 : i32
    %c0_i32_1 = arith.constant 0 : i32
    return %c0_i32, %c0_i32_0 : i32, i32
  }
}

</mosaic_0001>

<bundles_post_ra>
// kernel: _forward_impl.1
= control target key start
LH: loop header
LB: loop body
LE: loop exit
PB: predicated region body
PF: predicated region fallthrough
CT: control target
= control target key end

     0   :  { %s1192_s20 = smov 0   ;;  %s1194_s21 = smov 0   ;;  %s1324_s0 = inlined_call_operand.vmem [shape: f32[4,32], index: 0, kind: input, shape index: {}]   ;;  %s1325_s1 = inlined_call_operand.vmem [shape: f32[4,16], index: 1, kind: input, shape index: {}]   ;;  %s1326_s2 = inlined_call_operand.vmem [shape: f32[2,2], index: 2, kind: input, shape index: {}]   ;;  %s1327_s3 = inlined_call_operand.vmem [shape: bf16[32,32], index: 3, kind: input, shape index: {}]   ;;  %s1328_s4 = inlined_call_operand.vmem [shape: bf16[16,32], index: 4, kind: input, shape index: {}]   ;;  %s1329_s5 = inlined_call_operand.vmem [shape: f32[1,32], index: 5, kind: input, shape index: {}, may-alias: {5,7}]   ;;  %s1330_s6 = inlined_call_operand.vmem [shape: bf16[32,32], index: 6, kind: input, shape index: {}]   ;;  %s1331_s7 = inlined_call_operand.vmem [shape: f32[1,32], index: 7, kind: input, shape index: {}, may-alias: {5,7}]   ;;  %s1332_s8 = inlined_call_operand.vmem [shape: bf16[32,768], index: 8, kind: input, shape index: {}]   ;;  %s1333_s9 = inlined_call_operand.vmem [shape: f32[1,768], index: 9, kind: input, shape index: {}]   ;;  %s1334_s10 = inlined_call_operand.vmem [shape: bf16[768,128], index: 10, kind: input, shape index: {}]   ;;  %s1335_s11 = inlined_call_operand.vmem [shape: f32[1,128], index: 11, kind: input, shape index: {}]   ;;  %s1336_s12 = inlined_call_operand.vmem [shape: f32[2,128], index: 12, kind: output, shape index: {}]  }
   0x1   :  { %s1196_s22 = smov 0  }
   0x2 LB: > { %s1208_s23 = sadd.s32 4294967295, %s1124_s22   ;;  %s1211_s24 = sadd.s32 1, %s1124_s22   ;;  %s1124_s22 = sphi %s1196_s22, %s1339_s22   ;;  %s1120_s21 = sphi %s1194_s21, %s1338_s21   ;;  %s1116_s20 = sphi %s1192_s20, %s1337_s20  }
   0x3   : > { %s194_s25 = ssub.s32 %s1124_s22, %s1211_s24  ;;  %s197_s26 = sadd.s32 1, %s1120_s21 }
   0x4   : > { %p195_p0 = scmp.eq.s32.totalorder %s194_s25, 0  ;;  %p204_p1 = scmp.ne.s32.totalorder %s1120_s21, %s1116_s20 }
   0x5   : > { %p205_p2 = scmp.eq.s32.totalorder %s1124_s22, 0  ;;  %p924_p4 = scmp.ge.s32.totalorder %s1124_s22, 3 }
   0x6   : > { %s1220_s27 = scalar_select %p195_p0, %s1120_s21, %s197_s26  }
   0x7   : > { %p206_p3 = por %p205_p2, %p204_p1  ;;  %351 = sbr.rel (%p924_p4) target bundleno = 20 (0x14), region = 52 }
   0xc   : > { %354 = sbr.rel (!%p206_p3) target bundleno = 20 (0x14), region = 56  ;;  %s356_s28 = sand.u32 (%p206_p3), 1, %s1120_s21  }
   0xd   : > { %s1042_s29 = sshll.u32 (%p206_p3), %s1124_s22, 3  ;;  %s925_s30 = sshll.u32 (%p206_p3), %s356_s28, 5 }
   0xe   : > { %s361_s14 = scalar_lea.vmem (%p206_p3), %s1332_s8, %s1042_s29  ;;  %s358_s15 = scalar_lea.vmem (%p206_p3), [#allocation4], %s925_s30 }
   0xf   : > { %v396_v0 = vld [vmem:[%s361_s14] sm:$0xff] (%p206_p3)  ;;  %v398_v1 = vld [vmem:[%s361_s14 + $0x18] sm:$0xff] (%p206_p3)  ;;  %v400_v2 = vld [vmem:[%s361_s14 + $0x30] sm:$0xff] (%p206_p3) }
  0x10   : > { %397 = vst [vmem:[%s358_s15] sm:$0xff] (%p206_p3), %v396_v0  ;;  %v402_v3 = vld [vmem:[%s361_s14 + $0x48] sm:$0xff] (%p206_p3) }
  0x11   : > { %399 = vst [vmem:[%s358_s15 + $0x8] sm:$0xff] %v398_v1 }
  0x12   : > { %401 = vst [vmem:[%s358_s15 + $0x10] sm:$0xff] %v400_v2 }
  0x13   : > { %403 = vst [vmem:[%s358_s15 + $0x18] sm:$0xff] %v402_v3 }
  0x14 PF: > { %p928_p5 = scmp.ge.s32.totalorder %s1124_s22, 1  ;;  %p425_p6 = scmp.lt.s32.totalorder %s1124_s22, 4 }
  0x16   : > { %p426_p7 = pnand %p928_p5, %p425_p6 }
  0x17   : > { %s432_s16 = sand.u32 (!%p426_p7), 1, %s1116_s20   ;;  %s930_s17 = sshll.u32 (!%p426_p7), %s1208_s23, 1 }
  0x18   : > { %429 = sbr.rel (%p426_p7) target bundleno = 880 (0x370), region = 102  ;;  %s929_s18 = sshll.u32 (!%p426_p7), %s432_s16, 5 }
  0x19   : > { %p479_p8 = scmp.lt.s32.totalorder (!%p426_p7), %s930_s17, 5  ;;  %s931_s19 = sshll.u32 (!%p426_p7), %s1208_s23, 5 }
  0x1a   : > { %p484_p9 = scmp.lt.s32.totalorder (!%p426_p7), %s931_s19, 95  ;;  %s1244_s20 = scalar_lea.vmem (!%p426_p7), [#allocation4], %s929_s18 }
  0x1b   : > { %p933_p10 = scmp.ne.s32.totalorder (!%p426_p7), %s1208_s23, 0 }
  0x1d   : > { %s1341_s17 = smov (!%p479_p8, %s930_s17), 5  ;;  %s1343_s19 = smov (!%p484_p9, %s931_s19), 95 }
  0x1e   : > { %s481_s28 = scalar_lea.vmem %s1333_s9, %s1341_s17  ;;  %s932_s22 = sshll.u32 %s1343_s19, 2 }
  0x1f   : > { %s1242_s13 = scalar_lea.vmem %s1334_s10, %s932_s22  ;;  %493 = sbr.rel (%p933_p10) target bundleno = 38 (0x26), region = 110 }
  0x24   : > { %v1126_v4 = vmov 0.0  }
  0x25   : > { %494 = vst [vmem:[#allocation3] sm:$0xf] %v1126_v4 }
  0x26 PF: > { %v1044_v5 = vld [vmem:[%s1327_s3 + $0x8] sm:$0xff]  ;;  %v1045_v6 = vld [vmem:[%s1328_s4] sm:$0xff]  ;;  %vm511_vm0 = vcmask 130048   ;;  %vm540_vm1 = vcmask 261120   ;;  %v967_v14 = vld [vmem:[%s1244_s20 + $0x10] sm:$0xf] }
  0x27   : > { %v501_v7 = vld [vmem:[%s1325_s1] sm:$0xf]  ;;  %550 = vmatpush.bf16.msra.mxu3 %v1044_v5  ;;  %522 = vmatpush.bf16.msra.mxu0 %v1045_v6  ;;  %v1047_v12 = vld [vmem:[%s1330_s6 + $0x8] sm:$0xff]  ;;  %v1050_v16 = vld [vmem:[%s1244_s20 + $0x14] sm:$0xf]  ;;  %vm600_vm2 = vcmask 257024  }
  0x28   : > { %v1043_v8 = vld [vmem:[%s1327_s3] sm:$0xff]  ;;  %v504_v9 = vpack.c.bf16 %v501_v7, %v501_v7  ;;  %v959_v29 = vld [vmem:[%s1244_s20] sm:$0xf]  ;;  %v1049_v30 = vld [vmem:[%s1244_s20 + $0x4] sm:$0xf0]  ;;  %p1039_p11 = scmp.ne.s32.totalorder %s1208_s23, 2 }
  0x29   : > { %v495_v10 = vld [vmem:[%s1324_s0] sm:$0xf]  ;;  %v969_v18 = vld [vmem:[%s1244_s20 + $0x18] sm:$0xf0]  ;;  %v1048_v31 = vld [vmem:[%s1244_s20 + $0x4] sm:$0xf]  ;;  %v960_v32 = vor.u32 %v1049_v30, %v959_v29 }
  0x2a   : > { %938 = vmatmul.msk.bf16.vlgmr.msra.gmra.mxu0 %vm511_vm0, %v504_v9  ;;  %v500_v11 = vpack.c.bf16 %v495_v10, %v495_v10  ;;  %v1046_v13 = vld [vmem:[%s1330_s6] sm:$0xff]  ;;  %v972_v19 = vor.u32 %v1050_v16, %v969_v18  ;;  %v961_v33 = vld [vmem:[%s1244_s20 + $0x8] sm:$0xf0]  ;;  %v1067_v35 = vld [vmem:[%s1242_s13 + $0x78] sm:$0xff] }
  0x2b   : > { %551 = vmatpush.bf16.msra.mxu3 %v1043_v8  ;;  %593 = vmatpush.bf16.msrb.mxu0 %v1047_v12  ;;  %v1051_v15 = vld [vmem:[%s1244_s20 + $0x14] sm:$0xf0]  ;;  %v964_v34 = vor.u32 %v1048_v31, %v961_v33  ;;  %v1059_v36 = vld [vmem:[%s1242_s13 + $0x38] sm:$0xff]  ;;  %v1066_v37 = vld [vmem:[%s1242_s13 + $0x70] sm:$0xff] }
  0x2c   : > { %v968_v17 = vor.u32 %v1051_v15, %v967_v14  ;;  %v1093_v22 = vld [vmem:[%s1329_s5] ss:$0 sm:$0xff]  ;;  %813 = vmatpush.bf16.msra.mxu2 %v1067_v35  ;;  %800 = vmatpush.bf16.msra.mxu1 %v1059_v36  ;;  %v1058_v38 = vld [vmem:[%s1242_s13 + $0x30] sm:$0xff]  ;;  %v1065_v39 = vld [vmem:[%s1242_s13 + $0x68] sm:$0xff] }
  0x2d   : > { %v1057_v40 = vld [vmem:[%s1242_s13 + $0x28] sm:$0xff]  ;;  %v1064_v41 = vld [vmem:[%s1242_s13 + $0x60] sm:$0xff]  ;;  %v1063_v48 = vld [vmem:[%s1242_s13 + $0x58] sm:$0xff] }
  0x2e   : > { %947 = vmatmul.msk.bf16.vlgmr.msra.gmra.mxu3 %vm540_vm1, %v500_v11  ;;  %v1094_v42 = vld [vmem:[%s1331_s7] ss:$0 sm:$0xff]  ;;  %v1062_v50 = vld [vmem:[%s1242_s13 + $0x50] sm:$0xff]  ;;  %v1055_v51 = vld [vmem:[%s1242_s13 + $0x18] sm:$0xff] }
  0x2f   : > { %594 = vmatpush.bf16.msrb.mxu0 %v1046_v13  ;;  %643 = vmatpush.bf16.msrb.mxu3 %v968_v17  ;;  %v1056_v49 = vld [vmem:[%s1242_s13 + $0x20] sm:$0xff]  ;;  %v1061_v52 = vld [vmem:[%s1242_s13 + $0x48] sm:$0xff]  ;;  %v1054_v53 = vld [vmem:[%s1242_s13 + $0x10] sm:$0xff] }
  0x30   : > { %814 = vmatpush.bf16.msra.mxu2 %v1066_v37  ;;  %801 = vmatpush.bf16.msra.mxu1 %v1058_v38  ;;  %v1060_v54 = vld [vmem:[%s1242_s13 + $0x40] sm:$0xff]  ;;  %v1053_v55 = vld [vmem:[%s1242_s13 + $0x8] sm:$0xff] }
  0x31   : > { %v1052_v56 = vld [vmem:[%s1242_s13] sm:$0xff] }
  0x32   : > { %v608_v57 = vld [vmem:[%s481_s28] sm:$0x3]  ;;  %v669_v11 = vld [vmem:[#allocation3] sm:$0xf] }
  0x33   : > { %656 = vmatpush.bf16.msra.mxu0 %v972_v19  ;;  %644 = vmatpush.bf16.msrb.mxu3 %v960_v32  ;;  %v611_v58 = vperm.slane %v608_v57, 1  ;;  %v610_v61 = vperm.slane %v608_v57, 0 }
  0x34   : > { %815 = vmatpush.bf16.msra.mxu2 %v1065_v39  ;;  %802 = vmatpush.bf16.msra.mxu1 %v1057_v40 }
  0x37   : > { %657 = vmatpush.bf16.msra.mxu0 %v964_v34 }
  0x38   : > { %816 = vmatpush.bf16.msra.mxu2 %v1064_v41  ;;  %803 = vmatpush.bf16.msra.mxu1 %v1056_v49 }
  0x3c   : > { %817 = vmatpush.bf16.msra.mxu2 %v1063_v48  ;;  %804 = vmatpush.bf16.msra.mxu1 %v1055_v51 }
  0x40   : > { %818 = vmatpush.bf16.msra.mxu2 %v1062_v50  ;;  %805 = vmatpush.bf16.msra.mxu1 %v1054_v53 }
  0x44   : > { %819 = vmatpush.bf16.msra.mxu2 %v1061_v52  ;;  %806 = vmatpush.bf16.msra.mxu1 %v1053_v55 }
  0x48   : > { %820 = vmatpush.bf16.msra.mxu2 %v1060_v54  ;;  %807 = vmatpush.bf16.msra.mxu1 %v1052_v56 }
  0xa7   : > { %v524_v20 = vpop.f32.mrf.mxu0 }
  0xaf   : > { %v526_v21 = vpop.f32.mrf.mxu0 }
  0xb1   : > { %v553_v23 = vpop.f32.mrf.mxu3 }
  0xb2   : > { %v554_v24 = vadd.f32 %v553_v23, %v524_v20 }
  0xb4   : > { %v561_v25 = vadd.f32 %v1093_v22, %v554_v24 }
  0xb6   : > { %v562_v26 = vmax.f32 %v561_v25, 0.0 }
  0xb8   : > { %v567_v27 = vpack.c.bf16 %v562_v26, %v562_v26 }
  0xb9   : > { %v555_v28 = vpop.f32.mrf.mxu3 }
  0xba   : > { %956 = vmatmul.msk.bf16.vlgmr.msrb.gmra.mxu0 %vm540_vm1, %v567_v27 }
 0x137   : > { %v596_v43 = vpop.f32.mrf.mxu0 }
 0x138   : > { %v597_v44 = vadd.f32 %v1094_v42, %v596_v43 }
 0x13a   : > { %601 = vst.msk [vmem:[#allocation2] sm:$0xf] %vm600_vm2, %v597_v44 }
 0x13f   : > { %v598_v45 = vpop.f32.mrf.mxu0 }
 0x141   : > { %v602_v46 = vld [vmem:[#allocation2] sm:$0xf] }
 0x142   : > { %v607_v47 = vpack.c.bf16 %v602_v46, %v602_v46 }
 0x144   : > { %973 = vmatmul.msk.bf16.vlgmr.msrb.gmra.mxu3 %vm540_vm1, %v607_v47  ;;  %974 = vmatmul.msk.bf16.vlgmr.msra.gmra.mxu0 %vm540_vm1, %v607_v47 }
 0x1c1   : > { %v659_v59 = vpop.f32.mrf.mxu0 }
 0x1c2   : > { %v660_v60 = vadd.f32 %v659_v59, %v611_v58 }
 0x1c4   : > { %1095 = vtanh.f32 %v660_v60 }
 0x1c7   : > { %v646_v62 = vpop.f32.mrf.mxu3 }
 0x1c8   : > { %v647_v63 = vadd.f32 %v646_v62, %v610_v61 }
 0x1c9   : > { %v661_v0 = vpop.f32.mrf.mxu0 }
 0x1ca   : > { %v1096_v1 = vpop.eup %1095  ;;  %1097 = vtanh.f32 %v647_v63 }
 0x1cb   : > { %v666_v2 = vadd.f32 1.0, %v1096_v1 }
 0x1cd   : > { %v668_v3 = vmul.f32 127.5, %v666_v2 }
 0x1cf   : > { %v648_v4 = vpop.f32.mrf.mxu3  ;;  %v703_v5 = vpack.c.bf16 %v668_v3, %v668_v3 }
 0x1d0   : > { %v1098_v6 = vpop.eup %1097 }
 0x1d1   : > { %821 = vmatmul.bf16.vlgmr.msra.gmra.mxu2 %v703_v5  ;;  %v665_v7 = vadd.f32 1.0, %v1098_v6 }
 0x1d3   : > { %v667_v8 = vmul.f32 127.5, %v665_v7 }
 0x1d5   : > { %v702_v9 = vpack.c.bf16 %v667_v8, %v667_v8 }
 0x1d7   : > { %808 = vmatmul.bf16.vlgmr.msra.gmra.mxu1 %v702_v9 }
 0x254   : > { %v809_v10 = vpop.f32.mrf.mxu1  ;;  %v822_v12 = vpop.f32.mrf.mxu2 }
 0x255   : > { %v823_v13 = vadd.f32 %v822_v12, %v809_v10 }
 0x257   : > { %v826_v14 = vadd.f32 %v823_v13, %v669_v11 }
 0x258   : > { %831 = sbr.rel (%p1039_p11) target bundleno = 880 (0x370), region = 114 }
 0x259   : > { %827 = vst [vmem:[#allocation3] sm:$0xf] %v826_v14 }
 0x25c   : > { %v811_v15 = vpop.f32.mrf.mxu1  ;;  %v824_v16 = vpop.f32.mrf.mxu2 }
 0x25d   : > { %v1099_v18 = vld [vmem:[%s1335_s11] ss:$0 sm:$0xff]  ;;  %vm840_vm3 = vcmask 1043456   ;;  %vm861_vm7 = vcmask 1041408  }
 0x260   : > { %v832_v17 = vld [vmem:[#allocation3] sm:$0xf] }
 0x261   : > { %v837_v19 = vadd.f32 %v1099_v18, %v832_v17 }
 0x263   : > { %v838_v20 = vmax.f32 %v837_v19, 0.0 }
 0x265   : > { %v839_v21 = vmul.f32 %v838_v20, %v838_v20 }
 0x267   : > { %v841_v22 = vsel %vm840_vm3, %v839_v21, 0.0 }
 0x268   : > { %842 = vadd.xlane.f32.xlu0 %v841_v22 }
 0x2db   : > { %v843_v23 = vpop.xlane.xlu0 %842 }
 0x2dc   : > { %v844_v24 = vadd.f32 1e-12, %v843_v23 }
 0x2de   : > { %1100 = vrsqrt.f32 %v844_v24  ;;  %vm851_vm5 = vweird.f32 %v844_v24 }
 0x2e4   : > { %v1101_v25 = vpop.eup %1100 }
 0x2e5   : > { %v846_v26 = vmul.f32 %v1101_v25, %v844_v24  ;;  %vm852_vm4 = vweird.f32 %v1101_v25 }
 0x2e6   : > { %vm853_vm6 = vmor %vm851_vm5, %vm852_vm4 }
 0x2e7   : > { %v847_v27 = vmul.f32 %v1101_v25, %v846_v26 }
 0x2e9   : > { %v848_v28 = vmul.f32 0.5, %v847_v27 }
 0x2eb   : > { %v849_v29 = vsub.f32 1.5, %v848_v28 }
 0x2ed   : > { %v850_v30 = vmul.f32 %v1101_v25, %v849_v29 }
 0x2ef   : > { %v854_v31 = vsel %vm853_vm6, %v1101_v25, %v850_v30 }
 0x2f0   : > { %v855_v32 = vmul.f32 %v854_v31, %v838_v20 }
 0x2f2   : > { %v857_v33 = vrot.slane %v855_v32, 2 }
 0x2f4   : > { %v859_v34 = vsub.f32 %v855_v32, %v857_v33 }
 0x2f6   : > { %v860_v35 = vmul.f32 %v859_v34, %v859_v34 }
 0x2f8   : > { %v862_v36 = vsel %vm861_vm7, %v860_v35, 0.0 }
 0x2f9   : > { %863 = vadd.xlane.f32.xlu0 %v862_v36 }
 0x36c   : > { %v864_v37 = vpop.xlane.xlu0 %863 }
 0x36d   : > { %v865_v38 = vmul.f32 10000.0, %v864_v37 }
 0x36f   : > { %866 = vst [vmem:[%s1336_s12] sm:$0x3] %v865_v38 }
 0x370 PF: > { %p19_p12 = scmp.ge.s32.totalorder %s1211_s24, 5   ;;  %s1337_s20 = smov %s1120_s21 }
 0x371   : > { %s1338_s21 = smov %s1220_s27  ;;  %s1339_s22 = smov %s1211_s24 }
 0x372   :  { %21 = sbr.rel (!%p19_p12) target bundleno = 2 (0x2), region = 151 }

</bundles_post_ra>
